<compile_context>
chip_gen: v5e
topology: v5e:2x2
jax: 0.10.0
libtpu: 0.0.40
codegen_flags: <defaults>
</compile_context>

<pallas_src>
import numpy as np
import jax
import jax.numpy as jnp
from jax.experimental import pallas as pl
from jax.experimental.pallas import tpu as pltpu

GROUPS = 8
BN_EPS = 1e-5
_SQRT1_2 = 0.7071067811865476


def _round_up(n, m):
    return ((n + m - 1) // m) * m


def _lane_target():
    """256 on the 256-wide-MXU generations (v6e/v7x), 128 otherwise."""
    try:
        kind = jax.devices()[0].device_kind.lower()
    except Exception:
        return 128
    return 256 if ("v6" in kind or "v7" in kind) else 128


# ----------------------------- Pallas kernels ------------------------------

def _erf(x):
    # Abramowitz & Stegun 7.1.26 rational approximation (float32-accurate for
    # the exact nn.GELU()); the divide runs on the EUP via approx reciprocal.
    a1, a2, a3, a4, a5 = (0.254829592, -0.284496736, 1.421413741,
                          -1.453152027, 1.061405429)
    p = 0.3275911
    sgn = jnp.where(x >= 0.0, 1.0, -1.0)
    z = jnp.abs(x)
    t = pl.reciprocal(1.0 + p * z, approx=True)
    poly = ((((a5 * t + a4) * t + a3) * t + a2) * t + a1) * t
    return sgn * (1.0 - poly * jnp.exp(-z * z))


def _hdr_fused_kernel(x_ref, f_ref, w1x_ref, w1f_ref, b1_ref, w2_ref, b2_ref,
                      epd_ref, wp_ref, bias_ref, o_ref):
    """route (1x1 -> GELU -> 1x1 -> softmax) -> group weighting ->
    3x folded (1x1 conv + BN) -> residual, P pixels packed per lane-row."""
    p3c = wp_ref.shape[0]                    # P * 3 * C   (weighted lanes)
    pf = f_ref.shape[1]                      # P * 3 * Cg  (packed feat lanes)
    groups = p3c // pf

    x = x_ref[...]                                                   # bf16
    f = f_ref[...]                                                   # bf16

    # route conv1 (+ exact GELU); x / feats kept separate (no Ex matmul later).
    h = (jnp.dot(x, w1x_ref[...], preferred_element_type=jnp.float32)
         + jnp.dot(f, w1f_ref[...], preferred_element_type=jnp.float32)
         + b1_ref[...])
    h = 0.5 * h * (1.0 + _erf(h * _SQRT1_2))

    # route conv2 -> per-pixel softmax logits (P x 3*groups packed lanes).
    s = (jnp.dot(h.astype(jnp.bfloat16), w2_ref[...],
                 preferred_element_type=jnp.float32) + b2_ref[...])
    # Shared row max: mathematically identical per pixel (shift invariance).
    s = s - jnp.max(s, axis=-1, keepdims=True)
    e = jnp.exp(s)

    # One 0/1 matmul yields BOTH the group-ordered expanded exp values and the
    # per-pixel softmax denominator already broadcast in the output layout.
    t = jnp.dot(e.astype(jnp.bfloat16), epd_ref[...],
                preferred_element_type=jnp.float32)
    eexp = t[:, :p3c]
    den = t[:, p3c:]

    # Feature expansion is a plain lane tile (no matmul).
    fexp = jnp.concatenate([f.astype(jnp.float32)] * groups, axis=-1)

    wgt = (eexp * fexp).astype(jnp.bfloat16)
    proj = jnp.dot(wgt, wp_ref[...], preferred_element_type=jnp.float32)

    o_ref[...] = (x.astype(jnp.float32)                         # residual
                  + proj * pl.reciprocal(den, approx=True)      # softmax norm
                  + bias_ref[...])                               # folded BN bias


def _conv3x3_banded_kernel(x_ref, band0_ref, band1_ref, band2_ref, bias_ref,
                           o_ref):
    """3x3 same-conv on one padded NHWC image via 3 width-banded bf16 matmuls."""
    hh = o_ref.shape[0]
    acc = jnp.dot(x_ref[pl.ds(0, hh), :], band0_ref[...],
                  preferred_element_type=jnp.float32)
    acc = acc + jnp.dot(x_ref[pl.ds(1, hh), :], band1_ref[...],
                        preferred_element_type=jnp.float32)
    acc = acc + jnp.dot(x_ref[pl.ds(2, hh), :], band2_ref[...],
                        preferred_element_type=jnp.float32)
    o_ref[...] = acc + bias_ref[...]


def conv3x3_pallas(pooled_nhwc, wc, bias):
    """3x3 / pad=1 conv.  Input read exactly once; bf16 data + bf16 bands."""
    B, h, w, C = pooled_nhwc.shape
    Cg = wc.shape[0]
    L = (w + 2) * C
    xp = jnp.pad(pooled_nhwc, ((0, 0), (1, 1), (1, 1), (0, 0)))
    xp = xp.reshape(B, h + 2, L).astype(jnp.bfloat16)

    # Constant numpy scatter pattern (no per-call .at[].add device scatters).
    sel = np.zeros((3, w, w + 2), np.float32)       # sel[dw, xo, xw]=1 iff xw==xo+dw
    for dw in range(3):
        for xo in range(w):
            sel[dw, xo, xo + dw] = 1.0

    bands = []
    for dh in range(3):
        a = jnp.transpose(wc[:, :, dh, :], (2, 1, 0)).astype(jnp.float32)  # (dw,C,Cg)
        band = jnp.einsum('dxr,dio->rixo', sel, a).reshape(L, w * Cg)
        bands.append(band.astype(jnp.bfloat16))
    brow = jnp.tile(bias.astype(jnp.float32), w).reshape(1, w * Cg)

    out = pl.pallas_call(
        _conv3x3_banded_kernel,
        out_shape=jax.ShapeDtypeStruct((B, h, w * Cg), jnp.float32),
        grid=(B,),
        in_specs=[pl.BlockSpec((None, h + 2, L), lambda b: (b, 0, 0))]
                 + [pl.BlockSpec((L, w * Cg), lambda b: (0, 0))] * 3
                 + [pl.BlockSpec((1, w * Cg), lambda b: (0, 0))],
        out_specs=pl.BlockSpec((None, h, w * Cg), lambda b: (b, 0, 0)),
        compiler_params=pltpu.CompilerParams(
            dimension_semantics=("parallel",)),
    )(xp, *bands, brow)
    return out.reshape(B, h, w, Cg)


# ------------------------------- forward ------------------------------------

def hdr_forward_pallas(x, params, groups=GROUPS, tile_rows=1024, pack=None):
    B, C, H, W = x.shape
    Cg = C // groups
    F3 = 3 * Cg                                   # concat feature channels/pixel
    Ch = (C + F3) // 2                            # route hidden width
    g3 = 3 * groups                               # route logits/pixel
    f32, bf16 = jnp.float32, jnp.bfloat16

    if pack is None:
        pack = max(1, _lane_target() // C)        # P=8 on v6e/v7x, 4 on v5e (C=32)
    P = pack
    PC, PF, PH, PG, P3C = P * C, P * F3, P * Ch, P * g3, P * 3 * C

    x_nhwc = jnp.transpose(x, (0, 2, 3, 1)).astype(f32)              # (B,H,W,C)

    # ---- multi-scale branch: avgpool (glue) + 3x3 conv (Pallas) + upsample
    feats = []
    for i in range(3):
        k = 2 ** (i + 1)
        # TODO(synk): average pooling kept as (tiny) plain-JAX glue.
        pooled = x_nhwc.reshape(B, H // k, k, W // k, k, C).mean(axis=(2, 4))
        y = conv3x3_pallas(pooled, params['scale_w'][i], params['scale_b'][i])
        # TODO(synk): bilinear upsample (fixed resampling weights) stays plain-JAX glue.
        y = jax.image.resize(y, (B, H, W, Cg), method='bilinear')
        feats.append(y)
    feat_cat = jnp.concatenate(feats, axis=-1).reshape(-1, F3)        # (N, 3Cg)

    # ---- pack P pixels per lane-row; x and feats stay SEPARATE kernel inputs.
    x_flat = x_nhwc.reshape(-1, C)
    N = x_flat.shape[0]
    Rn = -(-N // P)
    tr = max(8, min(_round_up(tile_rows, 8), _round_up(Rn, 8)))
    Rpad = _round_up(Rn, tr)
    Npad = Rpad * P
    if Npad != N:
        x_flat = jnp.pad(x_flat, ((0, Npad - N), (0, 0)))
        feat_cat = jnp.pad(feat_cat, ((0, Npad - N), (0, 0)))
    x_packed = x_flat.astype(bf16).reshape(Rpad, PC)
    f_packed = feat_cat.astype(bf16).reshape(Rpad, PF)

    # ---- weight folding (trace time); 0/1 selection patterns built in numpy.
    eyeP = np.eye(P, dtype=np.float32)
    W1 = params['route_w1'].astype(f32)                               # (Ch, Cr)
    W1x = jnp.kron(eyeP, W1[:, :C].T)                                 # (PC, PH)
    W1f = jnp.kron(eyeP, W1[:, C:].T)                                 # (PF, PH)
    W2 = jnp.kron(eyeP, params['route_w2'].astype(f32).T)             # (PH, PG)

    # Epd: routing exp values -> (a) group-ordered expanded lanes matching the
    # tiled-feature layout, (b) per-pixel softmax denominator broadcast over
    # that pixel's output lanes.  Pure 0/1 -> numpy.
    Epd = np.zeros((PG, P3C + PC), np.float32)
    for q in range(P):
        for i in range(3):
            for j in range(groups):
                r0 = j * PF + q * F3 + i * Cg
                Epd[q * g3 + i * groups + j, r0:r0 + Cg] = 1.0
        Epd[q * g3:(q + 1) * g3, P3C + q * C:P3C + (q + 1) * C] = 1.0

    # Folded projection (1x1 conv + BN running stats, inference mode), rows
    # permuted to the group-ordered weighted-lane layout (j, pixel, i, cg).
    Wp_list, bp_sum = [], jnp.zeros((C,), f32)
    for i in range(3):
        scale = params['bn_gamma'][i] / jnp.sqrt(params['bn_var'][i] + BN_EPS)
        Wp_list.append(params['proj_w'][i].astype(f32).T * scale[None, :])
        bp_sum = bp_sum + ((params['proj_b'][i] - params['bn_mean'][i]) * scale
                           + params['bn_beta'][i])
    Wsc = jnp.stack(Wp_list, axis=0)                                  # (3, C, C)
    Tjm = jnp.transpose(Wsc.reshape(3, groups, Cg, C), (1, 0, 2, 3))  # (g,3,Cg,C)
    Tjm = Tjm.reshape(groups, F3, C)
    Wp_big = jnp.einsum('jmo,qp->jqmpo', Tjm, eyeP).reshape(P3C, PC)

    weights = (
        W1x.astype(bf16),
        W1f.astype(bf16),
        jnp.tile(params['route_b1'].astype(f32), P).reshape(1, PH),
        W2.astype(bf16),
        jnp.tile(params['route_b2'].astype(f32), P).reshape(1, PG),
        jnp.asarray(Epd, bf16),
        Wp_big.astype(bf16),
        jnp.tile(bp_sum, P).reshape(1, PC),
    )

    out_packed = pl.pallas_call(
        _hdr_fused_kernel,
        out_shape=jax.ShapeDtypeStruct((Rpad, PC), jnp.float32),
        grid=(Rpad // tr,),
        in_specs=[pl.BlockSpec((tr, PC), lambda i: (i, 0)),
                  pl.BlockSpec((tr, PF), lambda i: (i, 0))]
                 + [pl.BlockSpec(wg.shape, lambda i: (0, 0)) for wg in weights],
        out_specs=pl.BlockSpec((tr, PC), lambda i: (i, 0)),
        compiler_params=pltpu.CompilerParams(
            dimension_semantics=("parallel",)),
    )(x_packed, f_packed, *weights)

    out = out_packed.reshape(Npad, C)[:N].reshape(B, H, W, C)
    return jnp.transpose(out, (0, 3, 1, 2))


# --------------------------- pure-JAX reference -----------------------------

def avg_pool_nchw(x, k):
    B, C, H, W = x.shape
    return x.reshape(B, C, H // k, k, W // k, k).mean(axis=(3, 5))


def hdr_reference(x, params, groups=GROUPS):
    B, C, H, W = x.shape
    Cg = C // groups
    hp = jax.lax.Precision.HIGHEST
    feats = []
    for i in range(3):
        k = 2 ** (i + 1)
        pooled = avg_pool_nchw(x, k)
        y = jax.lax.conv_general_dilated(
            pooled, params['scale_w'][i], (1, 1), ((1, 1), (1, 1)),
            dimension_numbers=('NCHW', 'OIHW', 'NCHW'), precision=hp)
        y = y + params['scale_b'][i][None, :, None, None]
        y = jax.image.resize(y, (B, Cg, H, W), method='bilinear')
        feats.append(y)
    route_in = jnp.concatenate([x] + feats, axis=1)
    h = jnp.einsum('bchw,oc->bohw', route_in, params['route_w1'], precision=hp)
    h = h + params['route_b1'][None, :, None, None]
    h = 0.5 * h * (1.0 + jax.scipy.special.erf(h / jnp.sqrt(2.0)))
    s = jnp.einsum('bchw,oc->bohw', h, params['route_w2'], precision=hp)
    s = s + params['route_b2'][None, :, None, None]
    rw = jax.nn.softmax(s, axis=1).reshape(B, 3, groups, H, W)
    out = x
    for i in range(3):
        weighted = (feats[i][:, None] * rw[:, i][:, :, None]).reshape(B, C, H, W)
        y = jnp.einsum('bchw,oc->bohw', weighted, params['proj_w'][i], precision=hp)
        y = y + params['proj_b'][i][None, :, None, None]
        scale = params['bn_gamma'][i] / jnp.sqrt(params['bn_var'][i] + BN_EPS)
        y = (y - params['bn_mean'][i][None, :, None, None]) * scale[None, :, None, None]
        y = y + params['bn_beta'][i][None, :, None, None]
        out = out + y
    return out


# ------------------------------ param init ----------------------------------

def init_params(key, C, groups):
    Cg = C // groups
    Cr = C + 3 * Cg
    Ch = Cr // 2
    ks = iter(jax.random.split(key, 32))

    def nrm(shape, std):
        return std * jax.random.normal(next(ks), shape, jnp.float32)

    return {
        'scale_w': [nrm((Cg, C, 3, 3), 0.08) for _ in range(3)],
        'scale_b': [nrm((Cg,), 0.05) for _ in range(3)],
        'route_w1': nrm((Ch, Cr), 0.2),
        'route_b1': nrm((Ch,), 0.05),
        'route_w2': nrm((3 * groups, Ch), 0.2),
        'route_b2': nrm((3 * groups,), 0.05),
        'proj_w': [nrm((C, C), 0.3) for _ in range(3)],
        'proj_b': [nrm((C,), 0.05) for _ in range(3)],
        'bn_gamma': [1.0 + nrm((C,), 0.2) for _ in range(3)],
        'bn_beta': [nrm((C,), 0.1) for _ in range(3)],
        'bn_mean': [nrm((C,), 0.1) for _ in range(3)],
        'bn_var': [1.0 + 0.2 * jnp.abs(jax.random.normal(next(ks), (C,), jnp.float32))
                   for _ in range(3)],
    }


if __name__ == "__main__":
    key = jax.random.PRNGKey(0)
    kx, kp = jax.random.split(key)
    B, C, H, W = 2, 32, 16, 16          # in_channels=32, groups=8
    x = jax.random.normal(kx, (B, C, H, W), jnp.float32)
    params = init_params(kp, C, GROUPS)

    out = jax.block_until_ready(hdr_forward_pallas(x, params))
    ref = jax.block_until_ready(hdr_reference(x, params))

    assert out.shape == (B, C, H, W), out.shape
    max_err = float(jnp.max(jnp.abs(out - ref)))
    if not jnp.allclose(out, ref, atol=5e-2, rtol=5e-2):
        raise AssertionError(f"Pallas output mismatch vs reference, max abs err = {max_err}")
    print("KERNEL_OK")
</pallas_src>

<mosaic_0001>
module attributes {stable_mosaic.version = 11 : i64} {
  func.func @_conv3x3_banded_kernel(%arg0: i32, %arg1: memref<1x10x320xbf16, #tpu.memory_space<vmem>>, %arg2: memref<320x32xbf16, #tpu.memory_space<vmem>>, %arg3: memref<320x32xbf16, #tpu.memory_space<vmem>>, %arg4: memref<320x32xbf16, #tpu.memory_space<vmem>>, %arg5: memref<1x32xf32, #tpu.memory_space<vmem>>, %arg6: memref<1x8x32xf32, #tpu.memory_space<vmem>>) attributes {dimension_semantics = [#tpu.dimension_semantics<parallel>], iteration_bounds = array<i64: 2>, scalar_prefetch = 0 : i64, scratch_operands = 0 : i64, tpu.core_type = #tpu.core_type<tc>, window_params = [{transform_indices = @transform_0, window_bounds = array<i64: 1, 10, 320>}, {pipeline_mode = #tpu.pipeline_mode<synchronous>, transform_indices = @transform_1, window_bounds = array<i64: 320, 32>}, {pipeline_mode = #tpu.pipeline_mode<synchronous>, transform_indices = @transform_2, window_bounds = array<i64: 320, 32>}, {pipeline_mode = #tpu.pipeline_mode<synchronous>, transform_indices = @transform_3, window_bounds = array<i64: 320, 32>}, {pipeline_mode = #tpu.pipeline_mode<synchronous>, transform_indices = @transform_4, window_bounds = array<i64: 1, 32>}, {transform_indices = @transform_5, window_bounds = array<i64: 1, 8, 32>}]} {
    %c0 = arith.constant 0 : index
    %c0_0 = arith.constant 0 : index
    %c0_1 = arith.constant 0 : index
    %0 = vector.load %arg1[%c0, %c0_0, %c0_1] : memref<1x10x320xbf16, #tpu.memory_space<vmem>>, vector<1x8x320xbf16>
    %1 = vector.shape_cast %0 : vector<1x8x320xbf16> to vector<8x320xbf16>
    %c0_2 = arith.constant 0 : index
    %c0_3 = arith.constant 0 : index
    %2 = vector.load %arg2[%c0_2, %c0_3] : memref<320x32xbf16, #tpu.memory_space<vmem>>, vector<320x32xbf16>
    %cst = arith.constant dense<0.000000e+00> : vector<8x32xf32>
    %3 = tpu.matmul %1, %2, %cst {dimension_numbers = #tpu.dot_dimension_numbers<[1], [0], [0], [1], [0, 0, 1, 1], [], []>} : vector<8x320xbf16>, vector<320x32xbf16>, vector<8x32xf32> -> vector<8x32xf32>
    %c0_4 = arith.constant 0 : index
    %c1 = arith.constant 1 : index
    %c0_5 = arith.constant 0 : index
    %4 = vector.load %arg1[%c0_4, %c1, %c0_5] : memref<1x10x320xbf16, #tpu.memory_space<vmem>>, vector<1x8x320xbf16>
    %5 = vector.shape_cast %4 : vector<1x8x320xbf16> to vector<8x320xbf16>
    %c0_6 = arith.constant 0 : index
    %c0_7 = arith.constant 0 : index
    %6 = vector.load %arg3[%c0_6, %c0_7] : memref<320x32xbf16, #tpu.memory_space<vmem>>, vector<320x32xbf16>
    %cst_8 = arith.constant dense<0.000000e+00> : vector<8x32xf32>
    %7 = tpu.matmul %5, %6, %cst_8 {dimension_numbers = #tpu.dot_dimension_numbers<[1], [0], [0], [1], [0, 0, 1, 1], [], []>} : vector<8x320xbf16>, vector<320x32xbf16>, vector<8x32xf32> -> vector<8x32xf32>
    %8 = arith.addf %3, %7 : vector<8x32xf32>
    %c0_9 = arith.constant 0 : index
    %c2 = arith.constant 2 : index
    %c0_10 = arith.constant 0 : index
    %9 = vector.load %arg1[%c0_9, %c2, %c0_10] : memref<1x10x320xbf16, #tpu.memory_space<vmem>>, vector<1x8x320xbf16>
    %10 = vector.shape_cast %9 : vector<1x8x320xbf16> to vector<8x320xbf16>
    %c0_11 = arith.constant 0 : index
    %c0_12 = arith.constant 0 : index
    %11 = vector.load %arg4[%c0_11, %c0_12] : memref<320x32xbf16, #tpu.memory_space<vmem>>, vector<320x32xbf16>
    %cst_13 = arith.constant dense<0.000000e+00> : vector<8x32xf32>
    %12 = tpu.matmul %10, %11, %cst_13 {dimension_numbers = #tpu.dot_dimension_numbers<[1], [0], [0], [1], [0, 0, 1, 1], [], []>} : vector<8x320xbf16>, vector<320x32xbf16>, vector<8x32xf32> -> vector<8x32xf32>
    %13 = arith.addf %8, %12 : vector<8x32xf32>
    %c0_14 = arith.constant 0 : index
    %c0_15 = arith.constant 0 : index
    %14 = vector.load %arg5[%c0_14, %c0_15] : memref<1x32xf32, #tpu.memory_space<vmem>>, vector<1x32xf32>
    %15 = vector.broadcast %14 : vector<1x32xf32> to vector<8x32xf32>
    %16 = arith.addf %13, %15 : vector<8x32xf32>
    %c0_16 = arith.constant 0 : index
    %c0_17 = arith.constant 0 : index
    %c0_18 = arith.constant 0 : index
    %17 = vector.load %arg6[%c0_16, %c0_17, %c0_18] : memref<1x8x32xf32, #tpu.memory_space<vmem>>, vector<1x8x32xf32>
    %18 = vector.shape_cast %17 : vector<1x8x32xf32> to vector<8x32xf32>
    %19 = vector.shape_cast %16 : vector<8x32xf32> to vector<1x8x32xf32>
    tpu.vector_store %arg6[%c0_16, %c0_17, %c0_18], %19 {strides = array<i32>} : memref<1x8x32xf32, #tpu.memory_space<vmem>>, vector<1x8x32xf32>,
    return
  }
  func.func @transform_0(%arg0: i32) -> (i32, i32, i32) {
    %c0_i32 = arith.constant 0 : i32
    %c0_i32_0 = arith.constant 0 : i32
    %c0_i32_1 = arith.constant 0 : i32
    return %arg0, %c0_i32, %c0_i32_0 : i32, i32, i32
  }
  func.func @transform_1(%arg0: i32) -> (i32, i32) {
    %c0_i32 = arith.constant 0 : i32
    %c0_i32_0 = arith.constant 0 : i32
    %c0_i32_1 = arith.constant 0 : i32
    return %c0_i32, %c0_i32_0 : i32, i32
  }
  func.func @transform_2(%arg0: i32) -> (i32, i32) {
    %c0_i32 = arith.constant 0 : i32
    %c0_i32_0 = arith.constant 0 : i32
    %c0_i32_1 = arith.constant 0 : i32
    return %c0_i32, %c0_i32_0 : i32, i32
  }
  func.func @transform_3(%arg0: i32) -> (i32, i32) {
    %c0_i32 = arith.constant 0 : i32
    %c0_i32_0 = arith.constant 0 : i32
    %c0_i32_1 = arith.constant 0 : i32
    return %c0_i32, %c0_i32_0 : i32, i32
  }
  func.func @transform_4(%arg0: i32) -> (i32, i32) {
    %c0_i32 = arith.constant 0 : i32
    %c0_i32_0 = arith.constant 0 : i32
    %c0_i32_1 = arith.constant 0 : i32
    return %c0_i32, %c0_i32_0 : i32, i32
  }
  func.func @transform_5(%arg0: i32) -> (i32, i32, i32) {
    %c0_i32 = arith.constant 0 : i32
    %c0_i32_0 = arith.constant 0 : i32
    %c0_i32_1 = arith.constant 0 : i32
    return %arg0, %c0_i32, %c0_i32_0 : i32, i32, i32
  }
}

</mosaic_0001>

<bundles_post_ra>
// kernel: tpu_custom_call.1
= control target key start
LH: loop header
LB: loop body
LE: loop exit
PB: predicated region body
PF: predicated region fallthrough
CT: control target
= control target key end

     0   :  { %10 = vsyncpa [#allocation3], 0  ;;  %s1735_s0 = inlined_call_operand.vmem [shape: bf16[2,10,320], index: 0, kind: input, shape index: {}]   ;;  %s1736_s1 = inlined_call_operand.vmem [shape: bf16[320,32], index: 1, kind: input, shape index: {}]   ;;  %s1737_s2 = inlined_call_operand.vmem [shape: bf16[320,32], index: 2, kind: input, shape index: {}]   ;;  %s1738_s3 = inlined_call_operand.vmem [shape: bf16[320,32], index: 3, kind: input, shape index: {}]   ;;  %s1739_s4 = inlined_call_operand.vmem [shape: f32[1,32], index: 4, kind: input, shape index: {}]   ;;  %s1740_s5 = inlined_call_operand.hbm [shape: f32[2,8,32], index: 5, kind: output, shape index: {}]  }
   0x1   :  { %12 = vsyncpa [#allocation3 + $0x1], 0  ;;  %s1422_s18 = smov 0   ;;  %s1424_s19 = smov 0  }
   0x2   :  { %s1426_s20 = smov 0   ;;  %s1428_s21 = smov 0  }
   0x3 LB: > { %s1443_s22 = sadd.s32 4294967295, %s1390_s21   ;;  %s974_s23 = sadd.s32 4294967294, %s1390_s21   ;;  %s1390_s21 = sphi %s1428_s21, %s1746_s21   ;;  %s1386_s20 = sphi %s1426_s20, %s1745_s20   ;;  %s1382_s19 = sphi %s1424_s19, %s1744_s19   ;;  %s1378_s18 = sphi %s1422_s18, %s1743_s18  }
   0x4   : > { %s1447_s24 = sadd.s32 1, %s1390_s21   ;;  %s135_s25 = sadd.s32 1, %s1386_s20 }
   0x5   : > { %s132_s26 = ssub.s32 %s1390_s21, %s1447_s24  ;;  %p145_p0 = scmp.ne.s32.totalorder %s1386_s20, %s1382_s19 }
   0x6   : > { %p133_p1 = scmp.eq.s32.totalorder %s132_s26, 0  ;;  %p146_p2 = scmp.eq.s32.totalorder %s1443_s22, 1 }
   0x7   : > { %p151_p3 = scmp.ne.s32.totalorder %s1382_s19, %s1378_s18  ;;  %p152_p4 = scmp.eq.s32.totalorder %s974_s23, 1 }
   0x8   : > { %s1458_s27 = scalar_select %p133_p1, %s1386_s20, %s135_s25  }
   0x9   : > { %p1460_p5 = por %p146_p2, %p145_p0  ;;  %p1464_p6 = por %p152_p4, %p151_p3 }
   0xa   : > { %p977_p7 = scmp.ge.s32.totalorder %s1390_s21, 1  ;;  %p190_p8 = scmp.lt.s32.totalorder %s1390_s21, 3 }
   0xc   : > { %p191_p9 = pnand %p977_p7, %p190_p8 }
   0xd   : > { %p218_p10 = scmp.lt.s32.totalorder (!%p191_p9), %s1443_s22, 1  ;;  %s215_s7 = sand.u32 (!%p191_p9), 1, %s1382_s19  }
   0xe   : > { %194 = sbr.rel (%p191_p9) target bundleno = 229 (0xe5), region = 40  ;;  %s978_s8 = sshll.u32 (!%p191_p9), %s215_s7, 3 }
   0xf   : > { %s1224_s9 = sshll.u32 (!%p191_p9), %s1443_s22, 3  ;;  %s217_s15 = scalar_lea.vmem (!%p191_p9), [#allocation2], %s978_s8 }
  0x10   : > { %s910_s12 = scalar_lea.hbm (!%p191_p9), %s1740_s5, %s1224_s9  ;;  %s912_s16 = sshll.u32 (!%p191_p9), %s217_s15, 4  ;;  %s913_s16 = int_to_ptr.vmem [resolvable:$true] %s912_s16 }
  0x13   : > { %v1254_v0 = vld [vmem:[%s1737_s2 + $0x38] sm:$0xff]  ;;  %v1253_v4 = vld [vmem:[%s1737_s2 + $0x30] sm:$0xff]  ;;  %s219_s17 = scalar_select %p218_p10, %s1443_s22, 1  ;;  %v1252_v8 = vld [vmem:[%s1737_s2 + $0x28] sm:$0xff]  ;;  %vm464_vm0 = vcmask 523264   ;;  %vm897_vm1 = vcmask 261120  }
  0x14   : > { %v1262_v1 = vld [vmem:[%s1737_s2 + $0x78] sm:$0xff]  ;;  %468 = vmatpush.bf16.msra.mxu0 %v1254_v0  ;;  %v1261_v5 = vld [vmem:[%s1737_s2 + $0x70] sm:$0xff]  ;;  %v1260_v9 = vld [vmem:[%s1737_s2 + $0x68] sm:$0xff]  ;;  %s900_s22 = scalar_lea.sflag [#allocation3], %s215_s7 }
  0x15   : > { %v1266_v2 = vld [vmem:[%s1737_s2 + $0x98] sm:$0xff]  ;;  %481 = vmatpush.bf16.msra.mxu1 %v1262_v1  ;;  %v1265_v6 = vld [vmem:[%s1737_s2 + $0x90] sm:$0xff]  ;;  %s1287_s6 = smul.u32 24, %s219_s17  ;;  %v1264_v10 = vld [vmem:[%s1737_s2 + $0x88] sm:$0xff] }
  0x16   : > { %v1234_v3 = vld [vmem:[%s1736_s1 + $0x38] sm:$0xff]  ;;  %498 = vmatpush.bf16.msra.mxu2 %v1266_v2  ;;  %v1233_v7 = vld [vmem:[%s1736_s1 + $0x30] sm:$0xff]  ;;  %v1232_v11 = vld [vmem:[%s1736_s1 + $0x28] sm:$0xff] }
  0x17   : > { %635 = vmatpush.bf16.msra.mxu3 %v1234_v3  ;;  %s1511_s17 = scalar_lea.vmem %s1735_s0, %s1287_s6  ;;  %v1251_v12 = vld [vmem:[%s1737_s2 + $0x20] sm:$0xff]  ;;  %v1242_v20 = vld [vmem:[%s1736_s1 + $0x78] sm:$0xff]  ;;  %v1241_v33 = vld [vmem:[%s1736_s1 + $0x70] sm:$0xff]  ;;  %s1348_s6 = scalar_lea.hbm %s1740_s5, 16 }
  0x18   : > { %469 = vmatpush.bf16.msra.mxu0 %v1253_v4  ;;  %v1259_v13 = vld [vmem:[%s1737_s2 + $0x60] sm:$0xff]  ;;  %v225_v14 = vld [vmem:[%s1511_s17 + $0x8] sm:$0xf]  ;;  %v1521_v15 = vld [vmem:[%s1511_s17 + $0x14] sm:$0x1] }
  0x19   : > { %482 = vmatpush.bf16.msra.mxu1 %v1261_v5  ;;  %v1263_v16 = vld [vmem:[%s1737_s2 + $0x80] sm:$0xff]  ;;  %v1529_v18 = vunpack.c.l.b16 %v225_v14  ;;  %v317_v19 = vunpack.c.l.b16 %v1521_v15  ;;  %v1540_v23 = vld [vmem:[%s1511_s17 + $0xc] sm:$0x11]  ;;  %v1250_v26 = vld [vmem:[%s1737_s2 + $0x18] sm:$0xff] }
  0x1a   : > { %499 = vmatpush.bf16.msra.mxu2 %v1265_v6  ;;  %v1231_v17 = vld [vmem:[%s1736_s1 + $0x20] sm:$0xff]  ;;  %v1258_v27 = vld [vmem:[%s1737_s2 + $0x58] sm:$0xff]  ;;  %v315_v28 = vunpack.c.l.b16 %v1540_v23  ;;  %v316_v29 = vunpack.c.h.b16 %v1540_v23  ;;  %v1249_v37 = vld [vmem:[%s1737_s2 + $0x10] sm:$0xff] }
  0x1b   : > { %636 = vmatpush.bf16.msra.mxu3 %v1233_v7  ;;  %v224_v21 = vld [vmem:[%s1511_s17] sm:$0xff]  ;;  %v320_v22 = vpack.c.b16 %v317_v19, %v1529_v18  ;;  %v1230_v30 = vld [vmem:[%s1736_s1 + $0x18] sm:$0xff]  ;;  %v1257_v38 = vld [vmem:[%s1737_s2 + $0x50] sm:$0xff]  ;;  %v509_v14 = vpack.c.b16 %v1529_v18, %v1529_v18 }
  0x1c   : > { %470 = vmatpush.bf16.msra.mxu0 %v1252_v8  ;;  %v1542_v24 = vunpack.c.l.b16 %v224_v21  ;;  %v1544_v25 = vunpack.c.h.b16 %v224_v21  ;;  %v1229_v39 = vld [vmem:[%s1736_s1 + $0x10] sm:$0xff]  ;;  %v1240_v41 = vld [vmem:[%s1736_s1 + $0x68] sm:$0xff]  ;;  %v1239_v47 = vld [vmem:[%s1736_s1 + $0x60] sm:$0xff] }
  0x1d   : > { %483 = vmatpush.bf16.msra.mxu1 %v1260_v9  ;;  %v336_v31 = vshrl.u32 %v320_v22, 16  ;;  %v338_v32 = vshll.u32 %v320_v22, 16  ;;  %v1248_v44 = vld [vmem:[%s1737_s2 + $0x8] sm:$0xff]  ;;  %v1247_v52 = vld [vmem:[%s1737_s2] sm:$0xff]  ;;  %v1274_v55 = vld [vmem:[%s1738_s3 + $0x38] sm:$0xff] }
  0x1e   : > { %500 = vmatpush.bf16.msra.mxu2 %v1264_v10  ;;  %v318_v35 = vpack.c.b16 %v315_v28, %v1542_v24  ;;  %v319_v36 = vpack.c.b16 %v316_v29, %v1544_v25  ;;  %v1256_v45 = vld [vmem:[%s1737_s2 + $0x48] sm:$0xff]  ;;  %v1255_v53 = vld [vmem:[%s1737_s2 + $0x40] sm:$0xff]  ;;  %v1238_v56 = vld [vmem:[%s1736_s1 + $0x58] sm:$0xff]  ;;  %v507_v61 = vpack.c.b16 %v1542_v24, %v1542_v24  ;;  %v508_v10 = vpack.c.b16 %v1544_v25, %v1544_v25 }
  0x1f   : > { %637 = vmatpush.bf16.msra.mxu3 %v1232_v11  ;;  %v340_v34 = vrot.slane %v338_v32, 1  ;;  %v1228_v46 = vld [vmem:[%s1736_s1 + $0x8] sm:$0xff]  ;;  %v1227_v54 = vld [vmem:[%s1736_s1] sm:$0xff]  ;;  %v1282_v57 = vld [vmem:[%s1738_s3 + $0x78] sm:$0xff] }
  0x20   : > { %471 = vmatpush.bf16.msra.mxu0 %v1251_v12  ;;  %v324_v42 = vshll.u32 %v318_v35, 16  ;;  %v331_v43 = vshll.u32 %v319_v36, 16  ;;  %v322_v48 = vshrl.u32 %v318_v35, 16  ;;  %v329_v50 = vshrl.u32 %v319_v36, 16  ;;  %v1246_v60 = vld [vmem:[%s1736_s1 + $0x98] sm:$0xff]  ;;  %v1273_v62 = vld [vmem:[%s1738_s3 + $0x30] sm:$0xff] }
  0x21   : > { %484 = vmatpush.bf16.msra.mxu1 %v1259_v13  ;;  %v341_v40 = vor.u32 %v340_v34, %v336_v31  ;;  %v1237_v63 = vld [vmem:[%s1736_s1 + $0x50] sm:$0xff]  ;;  %v1272_v2 = vld [vmem:[%s1738_s3 + $0x28] sm:$0xff]  ;;  %v1271_v6 = vld [vmem:[%s1738_s3 + $0x20] sm:$0xff] }
  0x22   : > { %501 = vmatpush.bf16.msra.mxu2 %v1263_v16  ;;  %v326_v49 = vrot.slane %v324_v42, 1  ;;  %v333_v51 = vrot.slane %v331_v43, 1  ;;  %v1281_v0 = vld [vmem:[%s1738_s3 + $0x70] sm:$0xff]  ;;  %v1236_v3 = vld [vmem:[%s1736_s1 + $0x48] sm:$0xff]  ;;  %v1235_v7 = vld [vmem:[%s1736_s1 + $0x40] sm:$0xff] }
  0x23   : > { %638 = vmatpush.bf16.msra.mxu3 %v1231_v17  ;;  %v1245_v1 = vld [vmem:[%s1736_s1 + $0x90] sm:$0xff]  ;;  %v1280_v4 = vld [vmem:[%s1738_s3 + $0x68] sm:$0xff]  ;;  %v1279_v8 = vld [vmem:[%s1738_s3 + $0x60] sm:$0xff] }
  0x24   : > { %472 = vmatpush.bf16.msra.mxu0 %v1250_v26  ;;  %v327_v58 = vor.u32 %v326_v49, %v322_v48  ;;  %v334_v59 = vor.u32 %v333_v51, %v329_v50  ;;  %v1244_v5 = vld [vmem:[%s1736_s1 + $0x88] sm:$0xff]  ;;  %v1243_v9 = vld [vmem:[%s1736_s1 + $0x80] sm:$0xff]  ;;  %v1270_v11 = vld [vmem:[%s1738_s3 + $0x18] sm:$0xff] }
  0x25   : > { %485 = vmatpush.bf16.msra.mxu1 %v1258_v27  ;;  %1060 = vmatmul.msk.bf16.vlgmr.msra.gmra.mxu2 %vm464_vm0, %v341_v40  ;;  %v1278_v12 = vld [vmem:[%s1738_s3 + $0x58] sm:$0xff]  ;;  %v1269_v16 = vld [vmem:[%s1738_s3 + $0x10] sm:$0xff]  ;;  %v674_v17 = vld [vmem:[%s1511_s17] sm:$0xee] }
  0x26   : > { %648 = vmatpush.bf16.msrb.mxu2 %v1242_v20  ;;  %v1286_v13 = vld [vmem:[%s1738_s3 + $0x98] sm:$0xff]  ;;  %v1277_v20 = vld [vmem:[%s1738_s3 + $0x50] sm:$0xff]  ;;  %v675_v18 = vld [vmem:[%s1511_s17 + $0x8] sm:$0xe]  ;;  %v718_v22 = vunpack.c.l.b16 %v674_v17  ;;  %v719_v25 = vunpack.c.h.b16 %v674_v17  ;;  %s914_s17 = sshll.u32 %s910_s12, 4  ;;  %s915_s17 = int_to_ptr.hbm [resolvable:$true] %s914_s17 }
  0x27   : > { %639 = vmatpush.bf16.msra.mxu3 %v1230_v30  ;;  %v1285_v21 = vld [vmem:[%s1738_s3 + $0x90] sm:$0xff]  ;;  %v1268_v24 = vld [vmem:[%s1738_s3 + $0x8] sm:$0xff]  ;;  %v720_v30 = vunpack.c.l.b16 %v675_v18  ;;  %v1267_v32 = vld [vmem:[%s1738_s3] sm:$0xff]  ;;  %s1342_s23 = sshra.s32 %s915_s17, 4  ;;  %s1343_s23 = int_to_ptr.hbm [resolvable:$true] %s1342_s23 }
  0x28   : > { %473 = vmatpush.bf16.msra.mxu0 %v1249_v37  ;;  %v1276_v26 = vld [vmem:[%s1738_s3 + $0x48] sm:$0xff]  ;;  %v721_v31 = vpack.c.b16 %v315_v28, %v718_v22  ;;  %v1275_v34 = vld [vmem:[%s1738_s3 + $0x40] sm:$0xff]  ;;  %s1344_s25 = scalar_lea.hbm %s1343_s23, 8  ;;  %p1349_p0 = scmp.lt.s32.totalorder %s1343_s23, %s1740_s5 }
  0x29   : > { %486 = vmatpush.bf16.msra.mxu1 %v1257_v38  ;;  %v1284_v27 = vld [vmem:[%s1738_s3 + $0x88] sm:$0xff]  ;;  %v1283_v35 = vld [vmem:[%s1738_s3 + $0x80] sm:$0xff]  ;;  %v723_v28 = vpack.c.b16 %v317_v19, %v720_v30  ;;  %p1345_p11 = scmp.ne.s32.totalorder %s1343_s23, %s1344_s25  ;;  %p1350_p1 = scmp.lt.s32.totalorder %s1348_s6, %s1344_s25 }
  0x2a   : > { %649 = vmatpush.bf16.msrb.mxu2 %v1241_v33  ;;  %v722_v33 = vpack.c.b16 %v316_v29, %v719_v25  ;;  %v724_v36 = vrot.slane %v721_v31, 1 }
  0x2b   : > { %640 = vmatpush.bf16.msra.mxu3 %v1229_v39  ;;  %v726_v23 = vrot.slane %v723_v28, 1  ;;  %p1346_p12 = pnand %p1345_p11, %p1460_p5  ;;  %p1351_p2 = por %p1350_p1, %p1349_p0 }
  0x2c   : > { %474 = vmatpush.bf16.msra.mxu0 %v1248_v44  ;;  %v725_v37 = vrot.slane %v722_v33, 1 }
  0x2d   : > { %487 = vmatpush.bf16.msra.mxu1 %v1256_v45  ;;  %p1347_p13 = pneg %p1346_p12 }
  0x2e   : > { %650 = vmatpush.bf16.msrb.mxu2 %v1240_v41 }
  0x2f   : > { %641 = vmatpush.bf16.msra.mxu3 %v1228_v46  ;;  %p1352_p3 = pnand %p1351_p2, %p1347_p13 }
  0x30   : > { %475 = vmatpush.bf16.msra.mxu0 %v1247_v52 }
  0x31   : > { %488 = vmatpush.bf16.msra.mxu1 %v1255_v53 }
  0x32   : > { %651 = vmatpush.bf16.msrb.mxu2 %v1239_v47 }
  0x33   : > { %642 = vmatpush.bf16.msra.mxu3 %v1227_v54  ;;  %476 = vmatmul.bf16.vlgmr.msra.gmra.mxu0 %v327_v58  ;;  %v1327_v58 = vld [vmem:[%s1739_s4] ss:$0 sm:$0xff] }
  0x34   : > { %489 = vmatmul.bf16.vlgmr.msra.gmra.mxu1 %v334_v59  ;;  %665 = vmatpush.bf16.msrb.mxu0 %v1246_v60 }
  0x35   : > { %852 = vmatpush.bf16.msrb.mxu1 %v1274_v55 }
  0x36   : > { %652 = vmatpush.bf16.msrb.mxu2 %v1238_v56  ;;  %643 = vmatmul.bf16.vlgmr.msra.gmra.mxu3 %v507_v61 }
  0x37   : > { %865 = vmatpush.bf16.msrb.mxu3 %v1282_v57 }
  0x38   : > { %666 = vmatpush.bf16.msrb.mxu0 %v1245_v1 }
  0x39   : > { %853 = vmatpush.bf16.msrb.mxu1 %v1273_v62 }
  0x3a   : > { %653 = vmatpush.bf16.msrb.mxu2 %v1237_v63 }
  0x3b   : > { %866 = vmatpush.bf16.msrb.mxu3 %v1281_v0 }
  0x3c   : > { %667 = vmatpush.bf16.msrb.mxu0 %v1244_v5 }
  0x3d   : > { %854 = vmatpush.bf16.msrb.mxu1 %v1272_v2 }
  0x3e   : > { %654 = vmatpush.bf16.msrb.mxu2 %v1236_v3 }
  0x3f   : > { %867 = vmatpush.bf16.msrb.mxu3 %v1280_v4 }
  0x40   : > { %668 = vmatpush.bf16.msrb.mxu0 %v1243_v9 }
  0x41   : > { %855 = vmatpush.bf16.msrb.mxu1 %v1271_v6 }
  0x42   : > { %655 = vmatpush.bf16.msrb.mxu2 %v1235_v7 }
  0x43   : > { %868 = vmatpush.bf16.msrb.mxu3 %v1279_v8  ;;  %1141 = vmatmul.msk.bf16.vlgmr.msrb.gmra.mxu0 %vm464_vm0, %v509_v14 }
  0x44   : > { %882 = vmatpush.bf16.msra.mxu0 %v1286_v13 }
  0x45   : > { %656 = vmatmul.bf16.vlgmr.msrb.gmra.mxu2 %v508_v10  ;;  %856 = vmatpush.bf16.msrb.mxu1 %v1270_v11 }
  0x47   : > { %869 = vmatpush.bf16.msrb.mxu3 %v1278_v12 }
  0x48   : > { %883 = vmatpush.bf16.msra.mxu0 %v1285_v21 }
  0x49   : > { %857 = vmatpush.bf16.msrb.mxu1 %v1269_v16 }
  0x4b   : > { %870 = vmatpush.bf16.msrb.mxu3 %v1277_v20 }
  0x4c   : > { %884 = vmatpush.bf16.msra.mxu0 %v1284_v27 }
  0x4d   : > { %858 = vmatpush.bf16.msrb.mxu1 %v1268_v24 }
  0x4f   : > { %871 = vmatpush.bf16.msrb.mxu3 %v1276_v26 }
  0x50   : > { %885 = vmatpush.bf16.msra.mxu0 %v1283_v35 }
  0x51   : > { %859 = vmatpush.bf16.msrb.mxu1 %v1267_v32 }
  0x53   : > { %872 = vmatpush.bf16.msrb.mxu3 %v1275_v34  ;;  %1222 = vmatmul.msk.bf16.vlgmr.msra.gmra.mxu0 %vm464_vm0, %v726_v23 }
  0x54   : > { %860 = vmatmul.bf16.vlgmr.msrb.gmra.mxu1 %v724_v36 }
  0x56   : > { %873 = vmatmul.bf16.vlgmr.msrb.gmra.mxu3 %v725_v37 }
  0xa8   : > { %v503_v29 = vpop.f32.mrf.mxu2 }
  0xb0   : > { %v477_v38 = vpop.f32.mrf.mxu0  ;;  %v505_v40 = vpop.f32.mrf.mxu2 }
  0xb1   : > { %v490_v39 = vpop.f32.mrf.mxu1 }
  0xb2   : > { %v491_v46 = vadd.f32 %v490_v39, %v477_v38 }
  0xb4   : > { %v504_v48 = vadd.f32 %v503_v29, %v491_v46 }
  0xb8   : > { %v479_v42 = vpop.f32.mrf.mxu0 }
  0xb9   : > { %v644_v41 = vpop.f32.mrf.mxu3  ;;  %v492_v15 = vpop.f32.mrf.mxu1 }
  0xba   : > { %v645_v51 = vadd.f32 %v644_v41, %v504_v48 }
  0xc0   : > { %v670_v43 = vpop.f32.mrf.mxu0 }
  0xc1   : > { %v646_v19 = vpop.f32.mrf.mxu3 }
  0xc8   : > { %v657_v44 = vpop.f32.mrf.mxu2  ;;  %v672_v45 = vpop.f32.mrf.mxu0 }
  0xc9   : > { %v658_v52 = vadd.f32 %v657_v44, %v645_v51 }
  0xcb   : > { %v671_v56 = vadd.f32 %v670_v43, %v658_v52 }
  0xd0   : > { %v659_v47 = vpop.f32.mrf.mxu2  ;;  %v887_v50 = vpop.f32.mrf.mxu0 }
  0xd1   : > { %v861_v49 = vpop.f32.mrf.mxu1 }
  0xd8   : > { %v889_v59 = vpop.f32.mrf.mxu0 }
  0xd9   : > { %v874_v53 = vpop.f32.mrf.mxu3  ;;  %v863_v55 = vpop.f32.mrf.mxu1 }
  0xda   : > { %v875_v54 = vadd.f32 %v874_v53, %v861_v49 }
  0xdc   : > { %v888_v57 = vadd.f32 %v887_v50, %v875_v54 }
  0xde   : > { %v891_v60 = vadd.f32 %v888_v57, %v671_v56 }
  0xe0   : > { %v896_v61 = vadd.f32 %v1327_v58, %v891_v60 }
  0xe1   : > { %v876_v62 = vpop.f32.mrf.mxu3 }
  0xe2   : > { %898 = vst.msk [vmem:[%s217_s15] sm:$0xff] %vm897_vm1, %v896_v61 }
  0xe3   : > { %1355 = shalt.err (!%p1352_p3)
}
  0xe4   : > { %1288 = dma.vmem_to_hbm [thread:$0]  (%p1460_p5), %s913_s16, 128, %s915_s17, %s900_s22  }
  0xe5 PF: > { %p1294_p4 = scmp.ge.s32.totalorder %s1390_s21, 2  ;;  %s926_s7 = sand.u32 1, %s1378_s18  }
  0xe6   : > { %s927_s10 = scalar_lea.sflag [#allocation3], %s926_s7 }
  0xe7   : > { %p1291_p7 = pnand %p1294_p4, %p1464_p6 }
  0xe9   : > { %p1292_p8 = pneg %p1291_p7 }
  0xeb   : > { %1373 = dma.done.wait (%p1292_p8), %s927_s10, 128  }
  0xec   : > { %1375 = vsyncadd (%p1292_p8), %s927_s10, 4294967168  ;;  %p15_p9 = scmp.ge.s32.totalorder %s1447_s24, 4   ;;  %s1743_s18 = smov %s1382_s19 }
  0xed   : > { %s1744_s19 = smov %s1386_s20  ;;  %s1745_s20 = smov %s1458_s27 }
  0xee   : > { %s1746_s21 = smov %s1447_s24  ;;  %17 = sbr.rel (!%p15_p9) target bundleno = 3 (0x3), region = 75 }
  0xf3   :  { %933 = vsyncpa [#allocation3], 1 }
  0xf4   :  { %935 = vsyncpa [#allocation3 + $0x1], 1 }

</bundles_post_ra>
